<compile_context>
chip_gen: v6e
topology: v6e:2x2x1
jax: 0.10.0
libtpu: 0.0.40
codegen_flags: <defaults>
</compile_context>

<pallas_src>
import jax
import jax.numpy as jnp
from jax.experimental import pallas as pl
from jax.experimental.pallas import tpu as pltpu


def alphazero_kernel(x_ref, w1_ref, b1_ref, w2_ref, b2_ref, w3_ref, b3_ref,
                     out_ref):
    x = x_ref[...]                                                  # (TB, 42) bf16

    # fc1 + ReLU (MXU in bf16, f32 accumulate; elementwise in f32)
    h = jnp.dot(x, w1_ref[...], preferred_element_type=jnp.float32) + b1_ref[...]
    h = jnp.maximum(h, 0.0).astype(jnp.bfloat16)                    # (TB, 256)

    # fc2 + ReLU
    h = jnp.dot(h, w2_ref[...], preferred_element_type=jnp.float32) + b2_ref[...]
    h = jnp.maximum(h, 0.0).astype(jnp.bfloat16)                    # (TB, 256)

    # output head
    logits = jnp.dot(h, w3_ref[...], preferred_element_type=jnp.float32) + b3_ref[...]
    # logits: (TB, 8) f32

    # softmax over logits[:, 0:7]
    pol = logits[:, 0:7]                                            # (TB, 7)
    m = jnp.max(pol, axis=1, keepdims=True)
    e = jnp.exp(pol - m)
    probs = e * pl.reciprocal(jnp.sum(e, axis=1, keepdims=True), approx=True)

    # sigmoid of the 8th logit (value estimate), via exp + approx reciprocal (EUP)
    v = logits[:, 7:8]                                              # (TB, 1)
    val = pl.reciprocal(1.0 + jnp.exp(-v), approx=True)

    # merged lane-friendly output slab: cols 0:7 = probs, col 7 = value
    out_ref[:, 0:7] = probs.astype(out_ref.dtype)
    out_ref[:, 7:8] = val.astype(out_ref.dtype)


def alphazero_forward(x, params, tb=1024):
    """x: (B, 42) float32.  Returns (prob_vector (B, 7), value_est (B,))."""
    w1, b1, w2, b2, w3, b3 = params
    B = x.shape[0]

    # Batch tile: multiple of 8 (sublane), capped at `tb`.
    TB = min(tb, ((B + 7) // 8) * 8)
    Bp = ((B + TB - 1) // TB) * TB
    grid = (Bp // TB,)

    # bf16 MXU operands; biases stay f32 (added after f32 accumulation).
    xb = x.astype(jnp.bfloat16)
    if Bp != B:
        xb = jnp.pad(xb, ((0, Bp - B), (0, 0)))
    w1b = w1.astype(jnp.bfloat16)
    w2b = w2.astype(jnp.bfloat16)
    w3b = w3.astype(jnp.bfloat16)

    flops = Bp * 2 * (42 * 256 + 256 * 256 + 256 * 8)
    transcendentals = Bp * 10                       # 8 exps + 2 approx recips / row
    bytes_accessed = (
        Bp * 42 * 2 + Bp * 8 * 4                    # input tile + merged output
        + (42 * 256 + 256 * 256 + 256 * 8) * 2      # bf16 weights
        + (256 + 256 + 8) * 4                       # f32 biases
    )

    out = pl.pallas_call(
        alphazero_kernel,
        out_shape=jax.ShapeDtypeStruct((Bp, 8), jnp.float32),
        grid=grid,
        in_specs=[
            pl.BlockSpec((TB, 42), lambda i: (i, 0)),      # x: tiled over batch
            pl.BlockSpec((42, 256), lambda i: (0, 0)),     # w1: pinned
            pl.BlockSpec((1, 256), lambda i: (0, 0)),      # b1: pinned
            pl.BlockSpec((256, 256), lambda i: (0, 0)),    # w2: pinned
            pl.BlockSpec((1, 256), lambda i: (0, 0)),      # b2: pinned
            pl.BlockSpec((256, 8), lambda i: (0, 0)),      # w3: pinned
            pl.BlockSpec((1, 8), lambda i: (0, 0)),        # b3: pinned
        ],
        out_specs=pl.BlockSpec((TB, 8), lambda i: (i, 0)),
        compiler_params=pltpu.CompilerParams(
            dimension_semantics=("parallel",)),
        cost_estimate=pl.CostEstimate(
            flops=int(flops),
            transcendentals=int(transcendentals),
            bytes_accessed=int(bytes_accessed)),
    )(xb, w1b, b1, w2b, b2, w3b, b3)

    prob = out[:B, 0:7]
    val = out[:B, 7]
    return prob, val


def init_params(key):
    """Deterministic synthetic parameters, shapes matching the nn.Module.

    Stored as (in_features, out_features); biases as (1, out_features)."""
    k1, k2, k3, k4, k5, k6 = jax.random.split(key, 6)
    w1 = jax.random.normal(k1, (42, 256), jnp.float32) * (1.0 / jnp.sqrt(42.0))
    b1 = jax.random.normal(k2, (1, 256), jnp.float32) * 0.01
    w2 = jax.random.normal(k3, (256, 256), jnp.float32) * (1.0 / jnp.sqrt(256.0))
    b2 = jax.random.normal(k4, (1, 256), jnp.float32) * 0.01
    w3 = jax.random.normal(k5, (256, 8), jnp.float32) * (1.0 / jnp.sqrt(256.0))
    b3 = jax.random.normal(k6, (1, 8), jnp.float32) * 0.01
    return (w1, b1, w2, b2, w3, b3)


def reference_forward(x, params):
    """Pure-JAX f32 reference for correctness checking."""
    w1, b1, w2, b2, w3, b3 = params
    h = jnp.maximum(x @ w1 + b1, 0.0)
    h = jnp.maximum(h @ w2 + b2, 0.0)
    logits = h @ w3 + b3
    prob = jax.nn.softmax(logits[:, 0:7], axis=1)
    val = jax.nn.sigmoid(logits[:, 7])
    return prob, val


if __name__ == "__main__":
    key = jax.random.PRNGKey(0)
    kx, kp = jax.random.split(key)

    B = 2
    x = jax.random.normal(kx, (B, 42), jnp.float32)
    params = init_params(kp)

    prob, val = alphazero_forward(x, params)
    prob = jax.block_until_ready(prob)
    val = jax.block_until_ready(val)

    prob_ref, val_ref = reference_forward(x, params)
    assert prob.shape == (B, 7) and val.shape == (B,)
    # bf16 matmul operands + approx reciprocal -> loosened tolerance vs f32 ref
    assert jnp.allclose(prob, prob_ref, atol=3e-2, rtol=3e-2)
    assert jnp.allclose(val, val_ref, atol=3e-2, rtol=3e-2)
    assert bool(jnp.all(jnp.abs(jnp.sum(prob, axis=1) - 1.0) < 1e-2))

    print("KERNEL_OK")
</pallas_src>

<mosaic_0001>
module attributes {stable_mosaic.version = 11 : i64} {
  func.func @alphazero_kernel(%arg0: i32, %arg1: memref<8x42xbf16, #tpu.memory_space<vmem>>, %arg2: memref<42x256xbf16, #tpu.memory_space<vmem>>, %arg3: memref<1x256xf32, #tpu.memory_space<vmem>>, %arg4: memref<256x256xbf16, #tpu.memory_space<vmem>>, %arg5: memref<1x256xf32, #tpu.memory_space<vmem>>, %arg6: memref<256x8xbf16, #tpu.memory_space<vmem>>, %arg7: memref<1x8xf32, #tpu.memory_space<vmem>>, %arg8: memref<8x8xf32, #tpu.memory_space<vmem>>) attributes {dimension_semantics = [#tpu.dimension_semantics<parallel>], iteration_bounds = array<i64: 1>, scalar_prefetch = 0 : i64, scratch_operands = 0 : i64, tpu.core_type = #tpu.core_type<tc>, window_params = [{transform_indices = @transform_0, window_bounds = array<i64: 8, 42>}, {pipeline_mode = #tpu.pipeline_mode<synchronous>, transform_indices = @transform_1, window_bounds = array<i64: 42, 256>}, {pipeline_mode = #tpu.pipeline_mode<synchronous>, transform_indices = @transform_2, window_bounds = array<i64: 1, 256>}, {pipeline_mode = #tpu.pipeline_mode<synchronous>, transform_indices = @transform_3, window_bounds = array<i64: 256, 256>}, {pipeline_mode = #tpu.pipeline_mode<synchronous>, transform_indices = @transform_4, window_bounds = array<i64: 1, 256>}, {pipeline_mode = #tpu.pipeline_mode<synchronous>, transform_indices = @transform_5, window_bounds = array<i64: 256, 8>}, {pipeline_mode = #tpu.pipeline_mode<synchronous>, transform_indices = @transform_6, window_bounds = array<i64: 1, 8>}, {transform_indices = @transform_7, window_bounds = array<i64: 8, 8>}]} {
    %c0 = arith.constant 0 : index
    %c0_0 = arith.constant 0 : index
    %0 = vector.load %arg1[%c0, %c0_0] : memref<8x42xbf16, #tpu.memory_space<vmem>>, vector<8x42xbf16>
    %c0_1 = arith.constant 0 : index
    %c0_2 = arith.constant 0 : index
    %1 = vector.load %arg2[%c0_1, %c0_2] : memref<42x256xbf16, #tpu.memory_space<vmem>>, vector<42x256xbf16>
    %cst = arith.constant dense<0.000000e+00> : vector<8x256xf32>
    %2 = tpu.matmul %0, %1, %cst {dimension_numbers = #tpu.dot_dimension_numbers<[1], [0], [0], [1], [0, 0, 1, 1], [], []>} : vector<8x42xbf16>, vector<42x256xbf16>, vector<8x256xf32> -> vector<8x256xf32>
    %c0_3 = arith.constant 0 : index
    %c0_4 = arith.constant 0 : index
    %3 = vector.load %arg3[%c0_3, %c0_4] : memref<1x256xf32, #tpu.memory_space<vmem>>, vector<1x256xf32>
    %4 = vector.broadcast %3 : vector<1x256xf32> to vector<8x256xf32>
    %5 = arith.addf %2, %4 : vector<8x256xf32>
    %cst_5 = arith.constant 0.000000e+00 : f32
    %6 = vector.broadcast %cst_5 : f32 to vector<8x256xf32>
    %7 = arith.maximumf %5, %6 : vector<8x256xf32>
    %8 = arith.truncf %7 : vector<8x256xf32> to vector<8x256xbf16>
    %c0_6 = arith.constant 0 : index
    %c0_7 = arith.constant 0 : index
    %9 = vector.load %arg4[%c0_6, %c0_7] : memref<256x256xbf16, #tpu.memory_space<vmem>>, vector<256x256xbf16>
    %cst_8 = arith.constant dense<0.000000e+00> : vector<8x256xf32>
    %10 = tpu.matmul %8, %9, %cst_8 {dimension_numbers = #tpu.dot_dimension_numbers<[1], [0], [0], [1], [0, 0, 1, 1], [], []>} : vector<8x256xbf16>, vector<256x256xbf16>, vector<8x256xf32> -> vector<8x256xf32>
    %c0_9 = arith.constant 0 : index
    %c0_10 = arith.constant 0 : index
    %11 = vector.load %arg5[%c0_9, %c0_10] : memref<1x256xf32, #tpu.memory_space<vmem>>, vector<1x256xf32>
    %12 = vector.broadcast %11 : vector<1x256xf32> to vector<8x256xf32>
    %13 = arith.addf %10, %12 : vector<8x256xf32>
    %cst_11 = arith.constant 0.000000e+00 : f32
    %14 = vector.broadcast %cst_11 : f32 to vector<8x256xf32>
    %15 = arith.maximumf %13, %14 : vector<8x256xf32>
    %16 = arith.truncf %15 : vector<8x256xf32> to vector<8x256xbf16>
    %c0_12 = arith.constant 0 : index
    %c0_13 = arith.constant 0 : index
    %17 = vector.load %arg6[%c0_12, %c0_13] : memref<256x8xbf16, #tpu.memory_space<vmem>>, vector<256x8xbf16>
    %cst_14 = arith.constant dense<0.000000e+00> : vector<8x8xf32>
    %18 = tpu.matmul %16, %17, %cst_14 {dimension_numbers = #tpu.dot_dimension_numbers<[1], [0], [0], [1], [0, 0, 1, 1], [], []>} : vector<8x256xbf16>, vector<256x8xbf16>, vector<8x8xf32> -> vector<8x8xf32>
    %c0_15 = arith.constant 0 : index
    %c0_16 = arith.constant 0 : index
    %19 = vector.load %arg7[%c0_15, %c0_16] : memref<1x8xf32, #tpu.memory_space<vmem>>, vector<1x8xf32>
    %20 = vector.broadcast %19 : vector<1x8xf32> to vector<8x8xf32>
    %21 = arith.addf %18, %20 : vector<8x8xf32>
    %22 = vector.extract_strided_slice %21 {offsets = [0, 0], sizes = [8, 7], strides = [1, 1]} : vector<8x8xf32> to vector<8x7xf32>
    %cst_17 = arith.constant dense<0xFF800000> : vector<8xf32>
    %23 = vector.multi_reduction <maximumf>, %22, %cst_17 [1] : vector<8x7xf32> to vector<8xf32>
    %24 = vector.shape_cast %23 : vector<8xf32> to vector<8x1xf32>
    %25 = vector.broadcast %24 : vector<8x1xf32> to vector<8x7xf32>
    %26 = arith.subf %22, %25 : vector<8x7xf32>
    %27 = math.exp %26 : vector<8x7xf32>
    %cst_18 = arith.constant dense<0.000000e+00> : vector<8xf32>
    %28 = vector.multi_reduction <add>, %27, %cst_18 [1] : vector<8x7xf32> to vector<8xf32>
    %29 = vector.shape_cast %28 : vector<8xf32> to vector<8x1xf32>
    %30 = tpu.reciprocal %29 {approx = true} : vector<8x1xf32> -> vector<8x1xf32>
    %31 = vector.broadcast %30 : vector<8x1xf32> to vector<8x7xf32>
    %32 = arith.mulf %27, %31 : vector<8x7xf32>
    %33 = vector.extract_strided_slice %21 {offsets = [0, 7], sizes = [8, 1], strides = [1, 1]} : vector<8x8xf32> to vector<8x1xf32>
    %cst_19 = arith.constant 0.000000e+00 : f32
    %34 = vector.broadcast %cst_19 : f32 to vector<8x1xf32>
    %35 = arith.subf %34, %33 : vector<8x1xf32>
    %36 = math.exp %35 : vector<8x1xf32>
    %cst_20 = arith.constant 1.000000e+00 : f32
    %37 = vector.broadcast %cst_20 : f32 to vector<8x1xf32>
    %38 = arith.addf %37, %36 : vector<8x1xf32>
    %39 = tpu.reciprocal %38 {approx = true} : vector<8x1xf32> -> vector<8x1xf32>
    %c0_21 = arith.constant 0 : index
    %c0_22 = arith.constant 0 : index
    %40 = vector.load %arg8[%c0_21, %c0_22] : memref<8x8xf32, #tpu.memory_space<vmem>>, vector<8x7xf32>
    tpu.vector_store %arg8[%c0_21, %c0_22], %32 {strides = array<i32>} : memref<8x8xf32, #tpu.memory_space<vmem>>, vector<8x7xf32>,
    %c0_23 = arith.constant 0 : index
    %c7 = arith.constant 7 : index
    %41 = vector.load %arg8[%c0_23, %c7] : memref<8x8xf32, #tpu.memory_space<vmem>>, vector<8x1xf32>
    tpu.vector_store %arg8[%c0_23, %c7], %39 {strides = array<i32>} : memref<8x8xf32, #tpu.memory_space<vmem>>, vector<8x1xf32>,
    return
  }
  func.func @transform_0(%arg0: i32) -> (i32, i32) {
    %c0_i32 = arith.constant 0 : i32
    %c0_i32_0 = arith.constant 0 : i32
    return %arg0, %c0_i32 : i32, i32
  }
  func.func @transform_1(%arg0: i32) -> (i32, i32) {
    %c0_i32 = arith.constant 0 : i32
    %c0_i32_0 = arith.constant 0 : i32
    %c0_i32_1 = arith.constant 0 : i32
    return %c0_i32, %c0_i32_0 : i32, i32
  }
  func.func @transform_2(%arg0: i32) -> (i32, i32) {
    %c0_i32 = arith.constant 0 : i32
    %c0_i32_0 = arith.constant 0 : i32
    %c0_i32_1 = arith.constant 0 : i32
    return %c0_i32, %c0_i32_0 : i32, i32
  }
  func.func @transform_3(%arg0: i32) -> (i32, i32) {
    %c0_i32 = arith.constant 0 : i32
    %c0_i32_0 = arith.constant 0 : i32
    %c0_i32_1 = arith.constant 0 : i32
    return %c0_i32, %c0_i32_0 : i32, i32
  }
  func.func @transform_4(%arg0: i32) -> (i32, i32) {
    %c0_i32 = arith.constant 0 : i32
    %c0_i32_0 = arith.constant 0 : i32
    %c0_i32_1 = arith.constant 0 : i32
    return %c0_i32, %c0_i32_0 : i32, i32
  }
  func.func @transform_5(%arg0: i32) -> (i32, i32) {
    %c0_i32 = arith.constant 0 : i32
    %c0_i32_0 = arith.constant 0 : i32
    %c0_i32_1 = arith.constant 0 : i32
    return %c0_i32, %c0_i32_0 : i32, i32
  }
  func.func @transform_6(%arg0: i32) -> (i32, i32) {
    %c0_i32 = arith.constant 0 : i32
    %c0_i32_0 = arith.constant 0 : i32
    %c0_i32_1 = arith.constant 0 : i32
    return %c0_i32, %c0_i32_0 : i32, i32
  }
  func.func @transform_7(%arg0: i32) -> (i32, i32) {
    %c0_i32 = arith.constant 0 : i32
    %c0_i32_0 = arith.constant 0 : i32
    return %arg0, %c0_i32 : i32, i32
  }
}

</mosaic_0001>

<bundles_post_ra>
// kernel: tpu_custom_call.1
= control target key start
LH: loop header
LB: loop body
LE: loop exit
PB: predicated region body
PF: predicated region fallthrough
CT: control target
= control target key end

     0   :  { %12 = vsyncpa [#allocation3], 0  ;;  %s945_s0 = inlined_call_operand.vmem [shape: bf16[8,42], index: 0, kind: input, shape index: {}]   ;;  %s946_s1 = inlined_call_operand.vmem [shape: bf16[42,256], index: 1, kind: input, shape index: {}]   ;;  %s947_s2 = inlined_call_operand.vmem [shape: f32[1,256], index: 2, kind: input, shape index: {}]   ;;  %s948_s3 = inlined_call_operand.hbm [shape: bf16[256,256], index: 3, kind: input, shape index: {}]   ;;  %s949_s4 = inlined_call_operand.vmem [shape: f32[1,256], index: 4, kind: input, shape index: {}]   ;;  %s950_s5 = inlined_call_operand.vmem [shape: bf16[256,8], index: 5, kind: input, shape index: {}]   ;;  %s951_s6 = inlined_call_operand.vmem [shape: f32[1,8], index: 6, kind: input, shape index: {}]   ;;  %s952_s7 = inlined_call_operand.hbm [shape: f32[8,8], index: 7, kind: output, shape index: {}]  }
   0x1   :  { %13 = vsyncpa [#allocation4], 0  ;;  %s813_s24 = smov [#allocation2]  }
   0x2   :  { %s25_s25 = sshll.u32 %s813_s24, 4  ;;  %s26_s25 = int_to_ptr.vmem [resolvable:$true] %s25_s25 }
   0x3   :  { %s777_s26 = scalar_lea.vmem %s26_s25, 4096  ;;  %p782_p1 = scmp.lt.s32.totalorder %s26_s25, %s26_s25 }
   0x4   :  { %p778_p0 = scmp.ne.s32.totalorder %s26_s25, %s777_s26  ;;  %p783_p2 = scmp.lt.s32.totalorder %s777_s26, %s777_s26 }
   0x6   :  { %p784_p3 = por %p783_p2, %p782_p1 }
   0x8   :  { %p785_p4 = pnand %p784_p3, %p778_p0 }
   0xa   :  { %788 = shalt.err (!%p785_p4)
}
   0xb   :  { %s814_s27 = smov 128   ;;  %s815_s28 = smov 8  }
   0xc   :  { %31 = dma.hbm_to_vmem [thread:$0]  %s948_s3, 4096, %s26_s25, [#allocation3], %s814_s27, %s814_s27, %s815_s28  }
   0xd   :  { %809 = dma.done.wait [#allocation3], 4096  }
   0xe   :  { %810 = vsyncadd [#allocation3], 4294963200  ;;  %v816_v0 = vmov 0   ;;  %vm93_vm0 = vcmask 1044480   ;;  %v691_v3 = vld [vmem:[%s946_s1 + $0x14] ss:$8 sps:$4 sm:$0xff]   ;;  %v51_v53 = vlaneseq }
   0xf   :  { %132 = vmatprep.mubr.bf16.mxu0 %v816_v0  ;;  %v688_v1 = vld [vmem:[%s946_s1 + $0x24] ss:$8 sps:$4 sm:$0x1f]   ;;  %v690_v2 = vld [vmem:[%s946_s1 + $0x20] ss:$8 sps:$4 sm:$0x1f]  }
  0x10   :  { %610 = vmatprep.subr.msk.bf16.mxu0 %vm93_vm0, %v688_v1  ;;  %v95_v4 = vsel %vm93_vm0, %v690_v2, 0  ;;  %v693_v5 = vld [vmem:[%s946_s1 + $0x10] ss:$8 sps:$4 sm:$0xff]   ;;  %v694_v6 = vld [vmem:[%s946_s1 + $0x4] ss:$8 sps:$4 sm:$0xff]   ;;  %vm89_vm1 = vcmask 343040  }
  0x11   :  { %111 = vmatpush1.bf16.msra.mxu0 %v95_v4  ;;  %v697_v7 = vld [vmem:[#allocation2 + $0x74] ss:$8 sps:$4 sm:$0xff]   ;;  %v699_v8 = vld [vmem:[#allocation2 + $0x70] ss:$8 sps:$4 sm:$0xff]   ;;  %v700_v9 = vld [vmem:[#allocation2 + $0x64] ss:$8 sps:$4 sm:$0xff]  }
  0x12   :  { %112 = vmatprep.subr.bf16.mxu0 %v691_v3  ;;  %v696_v10 = vld [vmem:[%s946_s1] ss:$8 sps:$4 sm:$0xff]   ;;  %349 = vmatprep.subr.bf16.mxu1 %v697_v7  ;;  %v703_v12 = vld [vmem:[#allocation2 + $0x54] ss:$8 sps:$4 sm:$0xff]   ;;  %v705_v14 = vld [vmem:[#allocation2 + $0x50] ss:$8 sps:$4 sm:$0xff]  }
  0x13   :  { %350 = vmatpush1.bf16.msra.mxu1 %v699_v8  ;;  %v702_v11 = vld [vmem:[#allocation2 + $0x60] ss:$8 sps:$4 sm:$0xff]   ;;  %v706_v15 = vld [vmem:[#allocation2 + $0x44] ss:$8 sps:$4 sm:$0xff]   ;;  %v709_v17 = vld [vmem:[#allocation2 + $0x34] ss:$8 sps:$4 sm:$0xff]  }
  0x14   :  { %351 = vmatprep.subr.bf16.mxu1 %v700_v9  ;;  %v42_v13 = vld [vmem:[%s945_s0] sm:$0xf]  ;;  %v711_v18 = vld [vmem:[#allocation2 + $0x30] ss:$8 sps:$4 sm:$0xff]   ;;  %v712_v19 = vld [vmem:[#allocation2 + $0x24] ss:$8 sps:$4 sm:$0xff]  }
  0x15   :  { %113 = vmatpush1.bf16.msra.mxu0 %v693_v5  ;;  %v708_v16 = vld [vmem:[#allocation2 + $0x40] ss:$8 sps:$4 sm:$0xff]   ;;  %v715_v21 = vld [vmem:[#allocation2 + $0x14] ss:$8 sps:$4 sm:$0xff]   ;;  %v717_v22 = vld [vmem:[#allocation2 + $0x10] ss:$8 sps:$4 sm:$0xff]  }
  0x16   :  { %114 = vmatprep.subr.bf16.mxu0 %v694_v6  ;;  %v714_v20 = vld [vmem:[#allocation2 + $0x20] ss:$8 sps:$4 sm:$0xff]   ;;  %v718_v23 = vld [vmem:[#allocation2 + $0x4] ss:$8 sps:$4 sm:$0xff]   ;;  %v721_v25 = vld [vmem:[#allocation2 + $0xf4] ss:$8 sps:$4 sm:$0xff]  }
  0x17   :  { %352 = vmatpush1.bf16.msra.mxu1 %v702_v11  ;;  %v720_v24 = vld [vmem:[#allocation2] ss:$8 sps:$4 sm:$0xff]   ;;  %v723_v26 = vld [vmem:[#allocation2 + $0xf0] ss:$8 sps:$4 sm:$0xff]   ;;  %v724_v27 = vld [vmem:[#allocation2 + $0xe4] ss:$8 sps:$4 sm:$0xff]  }
  0x18   :  { %353 = vmatprep.subr.bf16.mxu1 %v703_v12  ;;  %v726_v28 = vld [vmem:[#allocation2 + $0xe0] ss:$8 sps:$4 sm:$0xff]   ;;  %v727_v29 = vld [vmem:[#allocation2 + $0xd4] ss:$8 sps:$4 sm:$0xff]   ;;  %v729_v30 = vld [vmem:[#allocation2 + $0xd0] ss:$8 sps:$4 sm:$0xff]  }
  0x19   :  { %115 = vmatpush1.bf16.msra.mxu0 %v696_v10  ;;  %v730_v31 = vld [vmem:[#allocation2 + $0xc4] ss:$8 sps:$4 sm:$0xff]   ;;  %v732_v32 = vld [vmem:[#allocation2 + $0xc0] ss:$8 sps:$4 sm:$0xff]   ;;  %v733_v33 = vld [vmem:[#allocation2 + $0xb4] ss:$8 sps:$4 sm:$0xff]  }
  0x1a   :  { %v735_v34 = vld [vmem:[#allocation2 + $0xb0] ss:$8 sps:$4 sm:$0xff]   ;;  %v736_v35 = vld [vmem:[#allocation2 + $0xa4] ss:$8 sps:$4 sm:$0xff]   ;;  %v738_v36 = vld [vmem:[#allocation2 + $0xa0] ss:$8 sps:$4 sm:$0xff]  }
  0x1b   :  { %354 = vmatpush1.bf16.msra.mxu1 %v705_v14  ;;  %v739_v37 = vld [vmem:[#allocation2 + $0x94] ss:$8 sps:$4 sm:$0xff]   ;;  %v741_v38 = vld [vmem:[#allocation2 + $0x90] ss:$8 sps:$4 sm:$0xff]   ;;  %v742_v39 = vld [vmem:[#allocation2 + $0x84] ss:$8 sps:$4 sm:$0xff]  }
  0x1c   :  { %611 = vmatmul.mubr.msk.bf16.vlgmr.msra.gmra.mxu0 %vm89_vm1, %v42_v13  ;;  %355 = vmatprep.subr.bf16.mxu1 %v706_v15  ;;  %v744_v40 = vld [vmem:[#allocation2 + $0x80] ss:$8 sps:$4 sm:$0xff]   ;;  %v745_v41 = vld [vmem:[%s950_s5 + $0x78] sm:$0xff]   ;;  %v747_v43 = vld [vmem:[%s950_s5 + $0x70] sm:$0xff]   ;;  %v52_v54 = vshrl.u32 %v51_v53, 7  ;;  %vm569_vm2 = vcmask 56320  }
  0x1d   :  { %v746_v42 = vld [vmem:[%s950_s5 + $0x38] sm:$0xff]   ;;  %661 = vmatprep.subr.bf16.mxu0 %v745_v41  ;;  %v748_v44 = vld [vmem:[%s950_s5 + $0x30] sm:$0xff]   ;;  %v749_v45 = vld [vmem:[%s950_s5 + $0x68] sm:$0xff]   ;;  %vm587_vm3 = vcmask 64568  }
  0x1e   :  { %662 = vmatpush3.bf16.msra.mxu0 %v746_v42  ;;  %v750_v46 = vld [vmem:[%s950_s5 + $0x28] sm:$0xff]   ;;  %v751_v47 = vld [vmem:[%s950_s5 + $0x60] sm:$0xff]   ;;  %v753_v49 = vld [vmem:[%s950_s5 + $0x58] sm:$0xff]   ;;  %v53_v55 = vsub.s32 0, %v52_v54  ;;  %v57_v57 = vsub.s32 1, %v52_v54 }
  0x1f   :  { %356 = vmatpush1.bf16.msra.mxu1 %v708_v16  ;;  %663 = vmatprep.subr.bf16.mxu0 %v747_v43  ;;  %v752_v48 = vld [vmem:[%s950_s5 + $0x20] sm:$0xff]   ;;  %v754_v50 = vld [vmem:[%s950_s5 + $0x18] sm:$0xff]   ;;  %v755_v51 = vld [vmem:[%s950_s5 + $0x50] sm:$0xff]  }
  0x20   :  { %357 = vmatprep.subr.bf16.mxu1 %v709_v17  ;;  %v756_v52 = vld [vmem:[%s950_s5 + $0x10] sm:$0xff]   ;;  %v49_v56 = vld [vmem:[%s947_s2] sm:$0x3]  ;;  %v757_v6 = vld [vmem:[%s950_s5 + $0x48] sm:$0xff]  }
  0x21   :  { %v54_v58 = vrot.slane %v49_v56, %v53_v55  ;;  %v58_v59 = vrot.slane %v49_v56, %v57_v57  ;;  %v758_v7 = vld [vmem:[%s950_s5 + $0x8] sm:$0xff]   ;;  %v759_v8 = vld [vmem:[%s950_s5 + $0x40] sm:$0xff]  }
  0x22   :  { %664 = vmatpush3.bf16.msra.mxu0 %v748_v44  ;;  %v760_v9 = vld [vmem:[%s950_s5] sm:$0xff]  }
  0x23   :  { %358 = vmatpush1.bf16.msra.mxu1 %v711_v18  ;;  %665 = vmatprep.subr.bf16.mxu0 %v749_v45  ;;  %v177_v10 = vld [vmem:[%s949_s4] sm:$0x3]  ;;  %s817_s4 = smov [#allocation5]  }
  0x24   :  { %359 = vmatprep.subr.bf16.mxu1 %v712_v19  ;;  %v182_v11 = vrot.slane %v177_v10, %v53_v55  ;;  %v186_v12 = vrot.slane %v177_v10, %v57_v57 }
  0x26   :  { %666 = vmatpush3.bf16.msra.mxu0 %v750_v46 }
  0x27   :  { %360 = vmatpush1.bf16.msra.mxu1 %v714_v20  ;;  %667 = vmatprep.subr.bf16.mxu0 %v751_v47 }
  0x28   :  { %361 = vmatprep.subr.bf16.mxu1 %v715_v21 }
  0x2a   :  { %668 = vmatpush3.bf16.msra.mxu0 %v752_v48 }
  0x2b   :  { %362 = vmatpush1.bf16.msra.mxu1 %v717_v22  ;;  %669 = vmatprep.subr.bf16.mxu0 %v753_v49 }
  0x2c   :  { %363 = vmatprep.subr.bf16.mxu1 %v718_v23 }
  0x2e   :  { %670 = vmatpush3.bf16.msra.mxu0 %v754_v50 }
  0x2f   :  { %364 = vmatpush1.bf16.msra.mxu1 %v720_v24  ;;  %671 = vmatprep.subr.bf16.mxu0 %v755_v51  ;;  %v644_v24 = vld [vmem:[%s951_s6] ss:$0 sm:$0xff]  ;;  %s595_s6 = sshll.u32 %s817_s4, 4  ;;  %s596_s6 = int_to_ptr.vmem [resolvable:$true] %s595_s6 }
  0x30   :  { %365 = vmatprep.subr.bf16.mxu1 %v721_v25  ;;  %s789_s29 = scalar_lea.vmem %s596_s6, 128  ;;  %p794_p6 = scmp.lt.s32.totalorder %s596_s6, %s596_s6 }
  0x31   :  { %p790_p5 = scmp.ne.s32.totalorder %s596_s6, %s789_s29  ;;  %p795_p7 = scmp.lt.s32.totalorder %s789_s29, %s789_s29 }
  0x32   :  { %672 = vmatpush3.bf16.msra.mxu0 %v756_v52 }
  0x33   :  { %366 = vmatpush2.bf16.msra.mxu1 %v723_v26  ;;  %673 = vmatprep.subr.bf16.mxu0 %v757_v6  ;;  %p796_p8 = por %p795_p7, %p794_p6 }
  0x34   :  { %367 = vmatprep.subr.bf16.mxu1 %v724_v27 }
  0x35   :  { %p797_p9 = pnand %p796_p8, %p790_p5 }
  0x36   :  { %674 = vmatpush3.bf16.msra.mxu0 %v758_v7 }
  0x37   :  { %368 = vmatpush2.bf16.msra.mxu1 %v726_v28  ;;  %675 = vmatprep.subr.bf16.mxu0 %v759_v8 }
  0x38   :  { %369 = vmatprep.subr.bf16.mxu1 %v727_v29 }
  0x3a   :  { %676 = vmatpush3.bf16.msra.mxu0 %v760_v9 }
  0x3b   :  { %370 = vmatpush2.bf16.msra.mxu1 %v729_v30 }
  0x3c   :  { %371 = vmatprep.subr.bf16.mxu1 %v730_v31 }
  0x3f   :  { %372 = vmatpush2.bf16.msra.mxu1 %v732_v32 }
  0x40   :  { %373 = vmatprep.subr.bf16.mxu1 %v733_v33 }
  0x43   :  { %374 = vmatpush2.bf16.msra.mxu1 %v735_v34 }
  0x44   :  { %375 = vmatprep.subr.bf16.mxu1 %v736_v35 }
  0x47   :  { %376 = vmatpush2.bf16.msra.mxu1 %v738_v36 }
  0x48   :  { %377 = vmatprep.subr.bf16.mxu1 %v739_v37 }
  0x4b   :  { %378 = vmatpush2.bf16.msra.mxu1 %v741_v38 }
  0x4c   :  { %379 = vmatprep.subr.bf16.mxu1 %v742_v39 }
  0x4f   :  { %380 = vmatpush2.bf16.msra.mxu1 %v744_v40 }
  0xdc   :  { %v134_v60 = vpop.f32.mrf.mxu0 }
  0xdd   :  { %v135_v61 = vadd.f32 %v134_v60, %v54_v58 }
  0xde   :  { %v136_v62 = vpop.f32.mrf.mxu0 }
  0xdf   :  { %v137_v63 = vadd.f32 %v136_v62, %v58_v59  ;;  %v141_v0 = vmax.f32 %v135_v61, 0.0 }
  0xe0   :  { %v138_v1 = vpop.f32.mrf.mxu0 }
  0xe1   :  { %v142_v2 = vmax.f32 %v137_v63, 0.0  ;;  %v143_v5 = vpack.c.bf16 %v141_v0, %v141_v0 }
  0xe2   :  { %v139_v3 = vpop.f32.mrf.mxu0 }
  0xe3   :  { %v144_v4 = vpack.c.bf16 %v142_v2, %v142_v2 }
  0xe5   :  { %381 = vmatprep.mubr.bf16.mxu1 %v144_v4 }
  0xe6   :  { %382 = vmatmul.mubr.bf16.vlgmr.msra.gmra.mxu1 %v143_v5 }
 0x1a6   :  { %v383_v13 = vpop.f32.mrf.mxu1 }
 0x1a7   :  { %v384_v14 = vadd.f32 %v383_v13, %v182_v11 }
 0x1a8   :  { %v385_v15 = vpop.f32.mrf.mxu1 }
 0x1a9   :  { %v386_v16 = vadd.f32 %v385_v15, %v186_v12  ;;  %v390_v17 = vmax.f32 %v384_v14, 0.0 }
 0x1aa   :  { %v387_v18 = vpop.f32.mrf.mxu1 }
 0x1ab   :  { %v391_v19 = vmax.f32 %v386_v16, 0.0  ;;  %v392_v22 = vpack.c.bf16 %v390_v17, %v390_v17 }
 0x1ac   :  { %v388_v20 = vpop.f32.mrf.mxu1 }
 0x1ad   :  { %v393_v21 = vpack.c.bf16 %v391_v19, %v391_v19 }
 0x1af   :  { %561 = vmatprep.mubr.bf16.mxu0 %v393_v21 }
 0x1b0   :  { %562 = vmatmul.mubr.bf16.vlgmr.msra.gmra.mxu0 %v392_v22 }
 0x270   :  { %v677_v23 = vpop.f32.mrf.mxu0 }
 0x272   :  { %v678_v25 = vpop.f32.mrf.mxu0 }
 0x273   :  { %v679_v26 = vadd.f32 %v678_v25, %v677_v23 }
 0x274   :  { %v680_v27 = vpop.f32.mrf.mxu0 }
 0x275   :  { %v564_v28 = vadd.f32 %v679_v26, %v644_v24 }
 0x276   :  { %v681_v29 = vpop.f32.mrf.mxu0 }
 0x277   :  { %v570_v30 = vsel %vm569_vm2, %v564_v28, -inf  ;;  %v581_v36 = vsub.f32 0.0, %v564_v28 }
 0x278   :  { %571 = vmax.xlane.f32.xlu0 %v570_v30 }
 0x279   :  { %v582_v37 = vmul.f32 1.442695, %v581_v36 }
 0x301   :  { %v572_v31 = vpop.xlane.xlu0 %571 }
 0x302   :  { %v573_v32 = vsub.f32 %v564_v28, %v572_v31 }
 0x304   :  { %v574_v33 = vmul.f32 1.442695, %v573_v32 }
 0x306   :  { %761 = vpow2.f32 %v574_v33 }
 0x307   :  { %763 = vpow2.f32 %v582_v37 }
 0x313   :  { %v762_v34 = vpop.eup %761 }
 0x314   :  { %v576_v35 = vsel %vm569_vm2, %v762_v34, 0.0  ;;  %v764_v38 = vpop.eup %763 }
 0x315   :  { %577 = vadd.xlane.f32.xlu0 %v576_v35  ;;  %v584_v39 = vadd.f32 1.0, %v764_v38 }
 0x39e   :  { %v578_v40 = vpop.xlane.xlu0 %577 }
 0x39f   :  { %765 = vrcp.f32 %v578_v40 }
 0x3a0   :  { %767 = vrcp.f32 %v584_v39 }
 0x3ac   :  { %v766_v41 = vpop.eup %765 }
 0x3ad   :  { %v580_v42 = vmul.f32 %v766_v41, %v762_v34  ;;  %v768_v43 = vpop.eup %767 }
 0x3af   :  { %586 = vst.msk [vmem:[#allocation5] sm:$0xff] %vm569_vm2, %v580_v42 }
 0x3b0   :  { %588 = vst.msk [vmem:[#allocation5] sm:$0xff] %vm587_vm3, %v768_v43 }
 0x3b1   :  { %800 = shalt.err (!%p797_p9)
}
 0x3b2   :  { %598 = dma.vmem_to_hbm [thread:$0]  %s596_s6, 128, %s952_s7, [#allocation4]  }
 0x3b3   :  { %811 = dma.done.wait [#allocation4], 128  }
 0x3b4   :  { %812 = vsyncadd [#allocation4], 4294967168 }
 0x3b5   :  { %602 = vsyncpa [#allocation3], 1 }
 0x3b6   :  { %603 = vsyncpa [#allocation4], 1 }

</bundles_post_ra>
